<compile_context>
chip_gen: v5e
topology: v5e:2x2
jax: 0.10.0
libtpu: 0.0.40
codegen_flags: <defaults>
</compile_context>

<pallas_src>
import functools

import jax
import jax.numpy as jnp
from jax import lax
from jax.experimental import pallas as pl
from jax.experimental.pallas import tpu as pltpu


_NEG_INF = -0.7 * float(jnp.finfo(jnp.float32).max)   # finite "-inf" (flash-safe)
_LN_EPS = 1e-5


def _pick_tile(dim, candidates):
    """Largest candidate tile that evenly divides `dim`, else the full dim."""
    for c in candidates:
        if dim >= c and dim % c == 0:
            return c
    return dim


# ---------------------------------------------------------------------------
# Tiled Linear:  y = act(x @ W^T + b) [+ residual]
#   x: (M, K), w: (N, K) PyTorch layout -- contracted directly on the MXU.
# ---------------------------------------------------------------------------
def _linear_kernel(x_ref, w_ref, b_ref, *rest, activation, has_residual):
    if has_residual:
        r_ref, o_ref, acc_ref = rest
    else:
        o_ref, acc_ref = rest
        r_ref = None

    @pl.when(pl.program_id(2) == 0)
    def _init():
        acc_ref[...] = jnp.zeros_like(acc_ref)

    # Contract K of x (tm,tk) with K of w (tn,tk): no transpose anywhere.
    acc_ref[...] += lax.dot_general(
        x_ref[...], w_ref[...],
        dimension_numbers=(((1,), (1,)), ((), ())),
        preferred_element_type=jnp.float32)

    @pl.when(pl.program_id(2) == pl.num_programs(2) - 1)
    def _finalize():
        y = acc_ref[...] + b_ref[...].astype(jnp.float32)
        if activation == "gelu":
            # TODO(synk): PyTorch nn.GELU() is the exact erf form; tanh-approx
            # GELU is used here because erf has no guaranteed Mosaic lowering.
            y = jax.nn.gelu(y, approximate=True)
        if has_residual:
            y = y + r_ref[...].astype(jnp.float32)
        o_ref[...] = y.astype(o_ref.dtype)


def _linear(x, w, b, *, activation=None, residual=None):
    M, K = x.shape
    N = w.shape[0]
    tm = _pick_tile(M, (256, 128))
    tn = _pick_tile(N, (512, 256, 128))
    tk = _pick_tile(K, (512, 256, 128))

    in_specs = [
        pl.BlockSpec((tm, tk), lambda i, j, k: (i, k)),
        pl.BlockSpec((tn, tk), lambda i, j, k: (j, k)),
        pl.BlockSpec((1, tn), lambda i, j, k: (0, j)),
    ]
    args = [x, w, b.reshape(1, N)]
    if residual is not None:
        in_specs.append(pl.BlockSpec((tm, tn), lambda i, j, k: (i, j)))
        args.append(residual)

    kernel = functools.partial(_linear_kernel, activation=activation,
                               has_residual=residual is not None)
    return pl.pallas_call(
        kernel,
        out_shape=jax.ShapeDtypeStruct((M, N), x.dtype),
        grid_spec=pltpu.PrefetchScalarGridSpec(
            num_scalar_prefetch=0,
            grid=(M // tm, N // tn, K // tk),
            in_specs=in_specs,
            out_specs=pl.BlockSpec((tm, tn), lambda i, j, k: (i, j)),
            scratch_shapes=[pltpu.VMEM((tm, tn), jnp.float32)],
        ),
        compiler_params=pltpu.CompilerParams(
            dimension_semantics=("parallel", "parallel", "arbitrary")),
    )(*args)


# ---------------------------------------------------------------------------
# LayerNorm over the feature (lane) axis.
# ---------------------------------------------------------------------------
def _layernorm_kernel(x_ref, g_ref, b_ref, o_ref, *, eps):
    x = x_ref[...].astype(jnp.float32)
    mean = jnp.mean(x, axis=-1, keepdims=True)
    xc = x - mean
    var = jnp.mean(xc * xc, axis=-1, keepdims=True)
    y = xc * lax.rsqrt(var + eps)
    o_ref[...] = (y * g_ref[...].astype(jnp.float32)
                  + b_ref[...].astype(jnp.float32)).astype(o_ref.dtype)


def _layer_norm(x, gamma, beta):
    M, D = x.shape
    tm = _pick_tile(M, (512, 256, 128))
    return pl.pallas_call(
        functools.partial(_layernorm_kernel, eps=_LN_EPS),
        out_shape=jax.ShapeDtypeStruct((M, D), x.dtype),
        grid_spec=pltpu.PrefetchScalarGridSpec(
            num_scalar_prefetch=0,
            grid=(M // tm,),
            in_specs=[
                pl.BlockSpec((tm, D), lambda i: (i, 0)),
                pl.BlockSpec((1, D), lambda i: (0, 0)),
                pl.BlockSpec((1, D), lambda i: (0, 0)),
            ],
            out_specs=pl.BlockSpec((tm, D), lambda i: (i, 0)),
        ),
        compiler_params=pltpu.CompilerParams(
            dimension_semantics=("parallel",)),
    )(x, gamma.reshape(1, D), beta.reshape(1, D))


# ---------------------------------------------------------------------------
# Flash-style multi-head attention.
#   q/k/v tiles arrive in lane-dense (seq_tile, d_model) layout; heads are
#   d_k-wide lane slices.  Grid = (batch, q-tile, k-tile), k-tile = reduction.
# ---------------------------------------------------------------------------
def _mha_flash_kernel(q_ref, k_ref, v_ref, mask_ref, o_ref,
                      m_sc, l_sc, acc_sc, *, n_head, d_k, inv_temp):
    ik = pl.program_id(2)

    @pl.when(ik == 0)
    def _init():
        m_sc[...] = jnp.full_like(m_sc, _NEG_INF)
        l_sc[...] = jnp.zeros_like(l_sc)
        acc_sc[...] = jnp.zeros_like(acc_sc)

    masked = mask_ref[...].astype(jnp.int32) == 0          # (tq, tk), mask.eq(0)
    q = q_ref[...] * inv_temp                              # fold 1/temperature
    k = k_ref[...]
    v = v_ref[...]

    for h in range(n_head):
        sl = slice(h * d_k, (h + 1) * d_k)
        # scores_h = q_h @ k_h^T : contract d_k of both operands (no transpose)
        s = lax.dot_general(q[:, sl], k[:, sl],
                            dimension_numbers=(((1,), (1,)), ((), ())),
                            preferred_element_type=jnp.float32)
        s = jnp.where(masked, _NEG_INF, s)                  # masked_fill(-inf)

        m_prev = m_sc[h]                                    # (tq, 1)
        l_prev = l_sc[h]
        m_new = jnp.maximum(m_prev, jnp.max(s, axis=-1, keepdims=True))
        alpha = jnp.exp(m_prev - m_new)
        p = jnp.exp(s - m_new)                              # (tq, tk)
        l_sc[h] = alpha * l_prev + jnp.sum(p, axis=-1, keepdims=True)
        m_sc[h] = m_new
        acc_sc[:, sl] = alpha * acc_sc[:, sl] + jnp.dot(
            p.astype(v.dtype), v[:, sl], preferred_element_type=jnp.float32)

    @pl.when(ik == pl.num_programs(2) - 1)
    def _finalize():
        outs = []
        for h in range(n_head):
            inv_l = pl.reciprocal(l_sc[h], approx=False)    # (tq, 1)
            outs.append(acc_sc[:, h * d_k:(h + 1) * d_k] * inv_l)
        # heads concatenated on the lane axis -> one lane-dense (tq, D) store
        o_ref[...] = jnp.concatenate(outs, axis=-1).astype(o_ref.dtype)


def _mha_attention(q_src, q_col, k_src, k_col, v_src, v_col, mask,
                   *, n_head, inv_temp, d_model):
    bs, lq = q_src.shape[0], q_src.shape[1]
    lk = k_src.shape[1]
    d_k = d_model // n_head
    tq = _pick_tile(lq, (256, 128))
    tk = _pick_tile(lk, (512, 256, 128))

    if mask is None:
        mask = jnp.ones((bs, lq, lk), jnp.int8)
    mask = mask.astype(jnp.int8)                            # 1 byte/elem DMA

    kernel = functools.partial(_mha_flash_kernel, n_head=n_head, d_k=d_k,
                               inv_temp=inv_temp)
    return pl.pallas_call(
        kernel,
        out_shape=jax.ShapeDtypeStruct((bs, lq, d_model), q_src.dtype),
        grid_spec=pltpu.PrefetchScalarGridSpec(
            num_scalar_prefetch=0,
            grid=(bs, lq // tq, lk // tk),
            in_specs=[
                pl.BlockSpec((pl.Squeezed(), tq, d_model),
                             lambda b, iq, ik, c=q_col: (b, iq, c)),
                pl.BlockSpec((pl.Squeezed(), tk, d_model),
                             lambda b, iq, ik, c=k_col: (b, ik, c)),
                pl.BlockSpec((pl.Squeezed(), tk, d_model),
                             lambda b, iq, ik, c=v_col: (b, ik, c)),
                pl.BlockSpec((pl.Squeezed(), tq, tk),
                             lambda b, iq, ik: (b, iq, ik)),
            ],
            out_specs=pl.BlockSpec((pl.Squeezed(), tq, d_model),
                                   lambda b, iq, ik: (b, iq, 0)),
            scratch_shapes=[
                pltpu.VMEM((n_head, tq, 1), jnp.float32),   # running max / head
                pltpu.VMEM((n_head, tq, 1), jnp.float32),   # running sum / head
                pltpu.VMEM((tq, d_model), jnp.float32),     # output accumulator
            ],
        ),
        compiler_params=pltpu.CompilerParams(
            dimension_semantics=("parallel", "parallel", "arbitrary")),
    )(q_src, k_src, v_src, mask)


def _mha_block(p, xq, xkv, mask, *, n_head, shared_qkv, residual):
    """DecoderMultiHeadAttention with the layer residual fused into its fc."""
    bs, lq, d = xq.shape
    lk = xkv.shape[1]
    d_k = d // n_head
    inv_temp = 1.0 / (float(d_k) ** 0.5)
    zeros_b = jnp.zeros((d,), xq.dtype)
    lane_fused = (d % 128 == 0)   # column-indexed q/k/v needs 128-aligned d_model

    if shared_qkv:
        # self-attention: single fused QKV projection of the shared input
        w_qkv = jnp.concatenate([p["w_qs_w"], p["w_ks_w"], p["w_vs_w"]], axis=0)
        b_qkv = jnp.concatenate([p["w_qs_b"], zeros_b, p["w_vs_b"]], axis=0)
        qkv = _linear(xq.reshape(bs * lq, d), w_qkv, b_qkv).reshape(bs, lq, 3 * d)
        if lane_fused:
            srcs = (qkv, 0, qkv, 1, qkv, 2)
        else:
            srcs = (qkv[:, :, :d], 0, qkv[:, :, d:2 * d], 0, qkv[:, :, 2 * d:], 0)
    else:
        # cross-attention: q alone, fused K/V over the encoder output
        q = _linear(xq.reshape(bs * lq, d), p["w_qs_w"], p["w_qs_b"]).reshape(bs, lq, d)
        w_kv = jnp.concatenate([p["w_ks_w"], p["w_vs_w"]], axis=0)
        b_kv = jnp.concatenate([zeros_b, p["w_vs_b"]], axis=0)
        kv = _linear(xkv.reshape(bs * lk, d), w_kv, b_kv).reshape(bs, lk, 2 * d)
        if lane_fused:
            srcs = (q, 0, kv, 0, kv, 1)
        else:
            srcs = (q, 0, kv[:, :, :d], 0, kv[:, :, d:], 0)

    ctx = _mha_attention(*srcs, mask, n_head=n_head, inv_temp=inv_temp, d_model=d)
    # output projection; the DecoderLayer residual add is fused into the finalize
    return _linear(ctx.reshape(bs * lq, d), p["fc_w"], p["fc_b"], residual=residual)


# ---------------------------------------------------------------------------
# DecoderLayer forward
# ---------------------------------------------------------------------------
def decoder_layer_forward(params, dec_input, enc_output,
                          self_attn_mask, cross_attn_mask, *, n_head):
    # TODO(synk): incremental-decode `cache` path (query = last token + concat)
    # is not implemented; this is the full-sequence (cache=None) forward.
    bs, lq, d = dec_input.shape

    x0 = dec_input.reshape(bs * lq, d)

    # ---- self-attention block (pre-LN, residual fused into fc) ----
    xn = _layer_norm(x0, params["self_attn_norm"]["gamma"],
                     params["self_attn_norm"]["beta"]).reshape(bs, lq, d)
    x1 = _mha_block(params["self_attn"], xn, xn, self_attn_mask,
                    n_head=n_head, shared_qkv=True, residual=x0)

    # ---- cross-attention block ----
    xn2 = _layer_norm(x1, params["cross_attn_norm"]["gamma"],
                      params["cross_attn_norm"]["beta"]).reshape(bs, lq, d)
    x2 = _mha_block(params["cross_attn"], xn2, enc_output, cross_attn_mask,
                    n_head=n_head, shared_qkv=False, residual=x1)

    # ---- MLP block (GELU fused into w1 finalize, residual into w2 finalize) ----
    xn3 = _layer_norm(x2, params["mlp_norm"]["gamma"], params["mlp_norm"]["beta"])
    h = _linear(xn3, params["mlp"]["w1_w"], params["mlp"]["w1_b"], activation="gelu")
    x3 = _linear(h, params["mlp"]["w2_w"], params["mlp"]["w2_b"], residual=x2)

    # Dropout layers are identity at inference.
    return x3.reshape(bs, lq, d)


# ---------------------------------------------------------------------------
# Parameters (PyTorch layout: Linear weight = (out_features, in_features))
# ---------------------------------------------------------------------------
def init_params(key, d_model, d_ff):
    keys = iter(jax.random.split(key, 32))
    s = 0.1

    def w(shape):
        return s * jax.random.normal(next(keys), shape, jnp.float32)

    def attn():
        return {
            "w_qs_w": w((d_model, d_model)), "w_qs_b": w((d_model,)),
            "w_ks_w": w((d_model, d_model)),                 # bias=False in PyTorch
            "w_vs_w": w((d_model, d_model)), "w_vs_b": w((d_model,)),
            "fc_w": w((d_model, d_model)), "fc_b": w((d_model,)),
        }

    def norm():
        return {
            "gamma": 1.0 + 0.1 * jax.random.normal(next(keys), (d_model,), jnp.float32),
            "beta": 0.1 * jax.random.normal(next(keys), (d_model,), jnp.float32),
        }

    return {
        "self_attn_norm": norm(), "self_attn": attn(),
        "cross_attn_norm": norm(), "cross_attn": attn(),
        "mlp_norm": norm(),
        "mlp": {"w1_w": w((d_ff, d_model)), "w1_b": w((d_ff,)),
                "w2_w": w((d_model, d_ff)), "w2_b": w((d_model,))},
    }


# ---------------------------------------------------------------------------
# Plain-JAX reference (mirrors the PyTorch module) for a sanity check
# ---------------------------------------------------------------------------
def _reference(params, dec_input, enc_output, self_mask, cross_mask, n_head):
    d = dec_input.shape[-1]
    d_k = d // n_head

    def layer_norm(x, g, b):
        mu = jnp.mean(x, axis=-1, keepdims=True)
        var = jnp.mean((x - mu) ** 2, axis=-1, keepdims=True)
        return (x - mu) * lax.rsqrt(var + _LN_EPS) * g + b

    def mha(p, q_in, kv_in, mask):
        bs, lq, _ = q_in.shape
        lk = kv_in.shape[1]
        q = q_in @ p["w_qs_w"].T + p["w_qs_b"]
        k = kv_in @ p["w_ks_w"].T
        v = kv_in @ p["w_vs_w"].T + p["w_vs_b"]
        q = q.reshape(bs, lq, n_head, d_k).transpose(0, 2, 1, 3)
        k = k.reshape(bs, lk, n_head, d_k).transpose(0, 2, 1, 3)
        v = v.reshape(bs, lk, n_head, d_k).transpose(0, 2, 1, 3)
        scores = jnp.einsum("bhqd,bhkd->bhqk", q, k) / (d_k ** 0.5)
        m0 = mask[:, None, :, :] == 0
        scores = jnp.where(m0, -jnp.inf, scores)
        attn = jax.nn.softmax(scores, axis=-1)
        attn = jnp.where(m0, 0.0, attn)
        out = jnp.einsum("bhqk,bhkd->bhqd", attn, v)
        out = out.transpose(0, 2, 1, 3).reshape(bs, lq, d)
        return out @ p["fc_w"].T + p["fc_b"]

    x = dec_input
    x = x + mha(params["self_attn"],
                layer_norm(x, params["self_attn_norm"]["gamma"],
                           params["self_attn_norm"]["beta"]),
                layer_norm(x, params["self_attn_norm"]["gamma"],
                           params["self_attn_norm"]["beta"]), self_mask)
    x = x + mha(params["cross_attn"],
                layer_norm(x, params["cross_attn_norm"]["gamma"],
                           params["cross_attn_norm"]["beta"]),
                enc_output, cross_mask)
    xn = layer_norm(x, params["mlp_norm"]["gamma"], params["mlp_norm"]["beta"])
    # tanh-approx GELU to match the kernel (PyTorch default is exact erf GELU)
    h = jax.nn.gelu(xn @ params["mlp"]["w1_w"].T + params["mlp"]["w1_b"],
                    approximate=True)
    return x + h @ params["mlp"]["w2_w"].T + params["mlp"]["w2_b"]


if __name__ == "__main__":
    bs, lq, lk_enc = 2, 8, 16
    d_model, n_head = 128, 4
    d_ff = 4 * d_model

    root = jax.random.PRNGKey(0)
    kp, kx, ke = jax.random.split(root, 3)
    params = init_params(kp, d_model, d_ff)

    dec_input = jax.random.normal(kx, (bs, lq, d_model), jnp.float32)
    enc_output = jax.random.normal(ke, (bs, lk_enc, d_model), jnp.float32)

    # Self-attention: causal mask (1 = keep, 0 = masked).
    self_mask = jnp.broadcast_to(jnp.tril(jnp.ones((lq, lq), jnp.int32)),
                                 (bs, lq, lq))
    # Cross-attention: padding mask (batch 1 only sees the first 12 frames).
    valid = jnp.array([lk_enc, 12], jnp.int32)
    cross_mask = (jnp.arange(lk_enc)[None, None, :] < valid[:, None, None])
    cross_mask = jnp.broadcast_to(cross_mask.astype(jnp.int32), (bs, lq, lk_enc))

    out = decoder_layer_forward(params, dec_input, enc_output,
                                self_mask, cross_mask, n_head=n_head)
    out = jax.block_until_ready(out)

    ref = _reference(params, dec_input, enc_output, self_mask, cross_mask, n_head)
    assert out.shape == (bs, lq, d_model)
    max_err = float(jnp.max(jnp.abs(out - ref)))
    assert jnp.allclose(out, ref, atol=5e-4, rtol=5e-4), \
        f"mismatch vs reference (max abs err {max_err})"

    print("KERNEL_OK")
</pallas_src>

<mosaic_0001>
module attributes {stable_mosaic.version = 11 : i64} {
  func.func @_layernorm_kernel(%arg0: i32, %arg1: memref<16x128xf32, #tpu.memory_space<vmem>>, %arg2: memref<1x128xf32, #tpu.memory_space<vmem>>, %arg3: memref<1x128xf32, #tpu.memory_space<vmem>>, %arg4: memref<16x128xf32, #tpu.memory_space<vmem>>) attributes {dimension_semantics = [#tpu.dimension_semantics<parallel>], iteration_bounds = array<i64: 1>, scalar_prefetch = 0 : i64, scratch_operands = 0 : i64, tpu.core_type = #tpu.core_type<tc>, window_params = [{transform_indices = @transform_0, window_bounds = array<i64: 16, 128>}, {pipeline_mode = #tpu.pipeline_mode<synchronous>, transform_indices = @transform_1, window_bounds = array<i64: 1, 128>}, {pipeline_mode = #tpu.pipeline_mode<synchronous>, transform_indices = @transform_2, window_bounds = array<i64: 1, 128>}, {transform_indices = @transform_3, window_bounds = array<i64: 16, 128>}]} {
    %c0 = arith.constant 0 : index
    %c0_0 = arith.constant 0 : index
    %0 = vector.load %arg1[%c0, %c0_0] : memref<16x128xf32, #tpu.memory_space<vmem>>, vector<16x128xf32>
    %cst = arith.constant dense<0.000000e+00> : vector<16xf32>
    %1 = vector.multi_reduction <add>, %0, %cst [1] : vector<16x128xf32> to vector<16xf32>
    %2 = vector.shape_cast %1 : vector<16xf32> to vector<16x1xf32>
    %cst_1 = arith.constant 1.280000e+02 : f32
    %3 = vector.broadcast %cst_1 : f32 to vector<16x1xf32>
    %4 = arith.divf %2, %3 : vector<16x1xf32>
    %5 = vector.broadcast %4 : vector<16x1xf32> to vector<16x128xf32>
    %6 = arith.subf %0, %5 : vector<16x128xf32>
    %7 = arith.mulf %6, %6 : vector<16x128xf32>
    %cst_2 = arith.constant dense<0.000000e+00> : vector<16xf32>
    %8 = vector.multi_reduction <add>, %7, %cst_2 [1] : vector<16x128xf32> to vector<16xf32>
    %9 = vector.shape_cast %8 : vector<16xf32> to vector<16x1xf32>
    %cst_3 = arith.constant 1.280000e+02 : f32
    %10 = vector.broadcast %cst_3 : f32 to vector<16x1xf32>
    %11 = arith.divf %9, %10 : vector<16x1xf32>
    %cst_4 = arith.constant 9.99999974E-6 : f32
    %12 = vector.broadcast %cst_4 : f32 to vector<16x1xf32>
    %13 = arith.addf %11, %12 : vector<16x1xf32>
    %14 = math.rsqrt %13 : vector<16x1xf32>
    %15 = vector.broadcast %14 : vector<16x1xf32> to vector<16x128xf32>
    %16 = arith.mulf %6, %15 : vector<16x128xf32>
    %c0_5 = arith.constant 0 : index
    %c0_6 = arith.constant 0 : index
    %17 = vector.load %arg2[%c0_5, %c0_6] : memref<1x128xf32, #tpu.memory_space<vmem>>, vector<1x128xf32>
    %18 = vector.broadcast %17 : vector<1x128xf32> to vector<16x128xf32>
    %19 = arith.mulf %16, %18 : vector<16x128xf32>
    %c0_7 = arith.constant 0 : index
    %c0_8 = arith.constant 0 : index
    %20 = vector.load %arg3[%c0_7, %c0_8] : memref<1x128xf32, #tpu.memory_space<vmem>>, vector<1x128xf32>
    %21 = vector.broadcast %20 : vector<1x128xf32> to vector<16x128xf32>
    %22 = arith.addf %19, %21 : vector<16x128xf32>
    %c0_9 = arith.constant 0 : index
    %c0_10 = arith.constant 0 : index
    %23 = vector.load %arg4[%c0_9, %c0_10] : memref<16x128xf32, #tpu.memory_space<vmem>>, vector<16x128xf32>
    tpu.vector_store %arg4[%c0_9, %c0_10], %22 {strides = array<i32>} : memref<16x128xf32, #tpu.memory_space<vmem>>, vector<16x128xf32>,
    return
  }
  func.func @transform_0(%arg0: i32) -> (i32, i32) {
    %c0_i32 = arith.constant 0 : i32
    %c0_i32_0 = arith.constant 0 : i32
    return %arg0, %c0_i32 : i32, i32
  }
  func.func @transform_1(%arg0: i32) -> (i32, i32) {
    %c0_i32 = arith.constant 0 : i32
    %c0_i32_0 = arith.constant 0 : i32
    %c0_i32_1 = arith.constant 0 : i32
    return %c0_i32, %c0_i32_0 : i32, i32
  }
  func.func @transform_2(%arg0: i32) -> (i32, i32) {
    %c0_i32 = arith.constant 0 : i32
    %c0_i32_0 = arith.constant 0 : i32
    %c0_i32_1 = arith.constant 0 : i32
    return %c0_i32, %c0_i32_0 : i32, i32
  }
  func.func @transform_3(%arg0: i32) -> (i32, i32) {
    %c0_i32 = arith.constant 0 : i32
    %c0_i32_0 = arith.constant 0 : i32
    return %arg0, %c0_i32 : i32, i32
  }
}

</mosaic_0001>

<bundles_post_ra>
// kernel: tpu_custom_call.1
= control target key start
LH: loop header
LB: loop body
LE: loop exit
PB: predicated region body
PF: predicated region fallthrough
CT: control target
= control target key end

     0   :  { %8 = vsyncpa [#allocation3], 0  ;;  %s264_s0 = inlined_call_operand.hbm [shape: f32[16,128], index: 0, kind: input, shape index: {}]   ;;  %s265_s1 = inlined_call_operand.hbm [shape: f32[1,128], index: 1, kind: input, shape index: {}]   ;;  %s266_s2 = inlined_call_operand.vmem [shape: f32[1,128], index: 2, kind: input, shape index: {}]   ;;  %s267_s3 = inlined_call_operand.hbm [shape: f32[16,128], index: 3, kind: output, shape index: {}]  }
   0x1   :  { %9 = vsyncpa [#allocation6], 0 }
   0x2   :  { %10 = vsyncpa [#allocation4], 0  ;;  %s15_s14 = sshll.u32 %s264_s0, 4  ;;  %s220_s15 = smov [#allocation2]   ;;  %s16_s14 = int_to_ptr.hbm [resolvable:$true] %s15_s14 }
   0x3   :  { %s17_s16 = sshll.u32 %s220_s15, 4  ;;  %s29_s19 = sshll.u32 %s265_s1, 4  ;;  %s18_s16 = int_to_ptr.vmem [resolvable:$true] %s17_s16  ;;  %s30_s19 = int_to_ptr.hbm [resolvable:$true] %s29_s19 }
   0x4   :  { %s221_s20 = smov 128   ;;  %s222_s21 = smov 8  }
   0x5   :  { %23 = dma.hbm_to_vmem [thread:$0]  %s16_s14, 256, %s18_s16, [#allocation3], %s221_s20, %s221_s20, %s222_s21  }
   0x6   :  { %s223_s22 = smov [#allocation5]  }
   0x7   :  { %s31_s23 = sshll.u32 %s223_s22, 4  ;;  %s32_s23 = int_to_ptr.vmem [resolvable:$true] %s31_s23 }
   0x8   :  { %34 = dma.hbm_to_vmem [thread:$0]  %s30_s19, 16, %s32_s23, [#allocation6]  }
   0x9   :  { %214 = dma.done.wait [#allocation3], 256  }
   0xa   :  { %215 = vsyncadd [#allocation3], 4294967040 }
   0xb   :  { %216 = dma.done.wait [#allocation6], 16  }
   0xc   :  { %217 = vsyncadd [#allocation6], 4294967280  ;;  %v45_v0 = vld [vmem:[#allocation2] sm:$0xff]  ;;  %v46_v1 = vld [vmem:[#allocation2 + $0x8] sm:$0xff]  ;;  %v224_v2 = vmov 128.0   ;;  %s225_s24 = smov [#allocation7]  }
   0xd   :  { %47 = vadd.xlane.f32.xlu0 %v45_v0  ;;  %136 = vrcp.f32 %v224_v2  ;;  %v134_v31 = vld [vmem:[#allocation5] ss:$0 sm:$0xff]  ;;  %v135_v35 = vld [vmem:[%s266_s2] ss:$0 sm:$0xff]  ;;  %s112_s25 = sshll.u32 %s225_s24, 4  ;;  %s114_s28 = sshll.u32 %s267_s3, 4  ;;  %s113_s25 = int_to_ptr.vmem [resolvable:$true] %s112_s25  ;;  %s115_s28 = int_to_ptr.hbm [resolvable:$true] %s114_s28 }
  0x13   :  { %v137_v3 = vpop.eup %136 }
  0x14   :  { %v52_v4 = vmul.f32 128.0, %v137_v3  ;;  %vm56_vm0 = vweird.f32 %v137_v3 }
  0x15   :  { %49 = vadd.xlane.f32.xlu0 %v46_v1 }
  0x16   :  { %v53_v5 = vsub.f32 1.0, %v52_v4 }
  0x18   :  { %v54_v6 = vmul.f32 %v137_v3, %v53_v5 }
  0x1a   :  { %v55_v7 = vadd.f32 %v137_v3, %v54_v6 }
  0x1c   :  { %v57_v8 = vsel %vm56_vm0, %v137_v3, %v55_v7 }
  0x80   :  { %v48_v9 = vpop.xlane.xlu0 %47 }
  0x81   :  { %v58_v10 = vmul.f32 %v57_v8, %v48_v9 }
  0x83   :  { %v60_v11 = vsub.f32 %v45_v0, %v58_v10 }
  0x85   :  { %v62_v12 = vmul.f32 %v60_v11, %v60_v11 }
  0x87   :  { %64 = vadd.xlane.f32.xlu1 %v62_v12 }
  0x88   :  { %v50_v13 = vpop.xlane.xlu0 %49 }
  0x89   :  { %v59_v14 = vmul.f32 %v57_v8, %v50_v13 }
  0x8b   :  { %v61_v15 = vsub.f32 %v46_v1, %v59_v14 }
  0x8d   :  { %v63_v16 = vmul.f32 %v61_v15, %v61_v15 }
  0x8f   :  { %66 = vadd.xlane.f32.xlu1 %v63_v16 }
  0xfa   :  { %v65_v17 = vpop.xlane.xlu1 %64 }
  0xfb   :  { %v68_v18 = vmul.f32 %v65_v17, %v57_v8 }
  0xfd   :  { %v70_v19 = vadd.f32 1e-05, %v68_v18 }
  0xff   :  { %138 = vrsqrt.f32 %v70_v19  ;;  %vm78_vm2 = vweird.f32 %v70_v19 }
 0x102   :  { %v67_v20 = vpop.xlane.xlu1 %66 }
 0x103   :  { %v69_v21 = vmul.f32 %v67_v20, %v57_v8 }
 0x105   :  { %v139_v22 = vpop.eup %138  ;;  %v71_v23 = vadd.f32 1e-05, %v69_v21 }
 0x106   :  { %v73_v24 = vmul.f32 %v139_v22, %v70_v19  ;;  %vm79_vm1 = vweird.f32 %v139_v22 }
 0x107   :  { %140 = vrsqrt.f32 %v71_v23  ;;  %vm80_vm3 = vmor %vm78_vm2, %vm79_vm1  ;;  %vm88_vm5 = vweird.f32 %v71_v23 }
 0x108   :  { %v74_v25 = vmul.f32 %v139_v22, %v73_v24 }
 0x10a   :  { %v75_v26 = vmul.f32 0.5, %v74_v25 }
 0x10c   :  { %v76_v27 = vsub.f32 1.5, %v75_v26 }
 0x10d   :  { %v141_v28 = vpop.eup %140 }
 0x10e   :  { %v77_v29 = vmul.f32 %v139_v22, %v76_v27  ;;  %v83_v30 = vmul.f32 %v141_v28, %v71_v23  ;;  %vm89_vm4 = vweird.f32 %v141_v28 }
 0x10f   :  { %vm90_vm6 = vmor %vm88_vm5, %vm89_vm4 }
 0x110   :  { %v81_v32 = vsel %vm80_vm3, %v139_v22, %v77_v29  ;;  %v84_v33 = vmul.f32 %v141_v28, %v83_v30 }
 0x111   :  { %v92_v34 = vmul.f32 %v81_v32, %v60_v11 }
 0x112   :  { %v85_v36 = vmul.f32 0.5, %v84_v33 }
 0x113   :  { %v98_v37 = vmul.f32 %v134_v31, %v92_v34 }
 0x114   :  { %v86_v38 = vsub.f32 1.5, %v85_v36 }
 0x115   :  { %v104_v39 = vadd.f32 %v135_v35, %v98_v37 }
 0x116   :  { %v87_v40 = vmul.f32 %v141_v28, %v86_v38 }
 0x117   :  { %106 = vst [vmem:[#allocation7] sm:$0xff] %v104_v39 }
 0x118   :  { %v91_v41 = vsel %vm90_vm6, %v141_v28, %v87_v40 }
 0x119   :  { %v93_v42 = vmul.f32 %v91_v41, %v61_v15 }
 0x11b   :  { %v99_v43 = vmul.f32 %v134_v31, %v93_v42 }
 0x11d   :  { %v105_v44 = vadd.f32 %v135_v35, %v99_v43 }
 0x11f   :  { %107 = vst [vmem:[#allocation7 + $0x8] sm:$0xff] %v105_v44 }
 0x120   :  { %120 = dma.vmem_to_hbm [thread:$0]  %s113_s25, 256, %s115_s28, [#allocation4], %s221_s20, %s221_s20, %s222_s21  }
 0x121   :  { %218 = dma.done.wait [#allocation4], 256  }
 0x122   :  { %219 = vsyncadd [#allocation4], 4294967040 }
 0x123   :  { %125 = vsyncpa [#allocation3], 1 }
 0x124   :  { %126 = vsyncpa [#allocation6], 1 }
 0x125   :  { %127 = vsyncpa [#allocation4], 1 }

</bundles_post_ra>
